<compile_context>
chip_gen: v5e
topology: v5e:2x2
jax: 0.10.0
libtpu: 0.0.40
codegen_flags: <defaults>
</compile_context>

<pallas_src>
import numpy as np
from math import factorial
from functools import reduce

import jax
import jax.numpy as jnp
from jax.experimental import pallas as pl
from jax.experimental.pallas import tpu as pltpu


def _make_moment_matrix(l: int) -> np.ndarray:
    """M[i, :] = (arange(l) - (l-1)//2)**i / i!   (same as _MK.__init__)."""
    M = np.zeros((l, l), dtype=np.float64)
    for i in range(l):
        M[i] = (np.arange(l) - (l - 1) // 2) ** i / factorial(i)
    return M


def _round_up(x: int, m: int) -> int:
    return ((x + m - 1) // m) * m


def _round_down(x: int, m: int) -> int:
    return (x // m) * m


def _k2m_kernel(wt_ref, k_ref, o_ref):
    # o = k @ W^T : (TB, N) @ (N, N) -> (TB, N).
    # Natural row-major batch tiling: the HBM read and write of every grid step are fully
    # contiguous slabs of k_flat / m_flat (no wrapper-side transposes, no extra HBM passes).
    # N (~25) sits on the lane axis so the output store is a masked vst; that store slot is
    # nowhere near binding in this DMA-bound kernel.
    acc = jnp.dot(
        k_ref[...].astype(jnp.float32),          # in-kernel cast keeps narrow dtypes narrow in HBM
        wt_ref[...],
        preferred_element_type=jnp.float32,
    )
    o_ref[...] = acc.astype(o_ref.dtype)


class K2M:
    """JAX / Pallas port of the PyTorch K2M / _MK moment transform."""

    _TB_ALIGN = 512              # batch-tile granularity (multiple of the 8-sublane requirement)
    _MAX_TB = 8192               # ~16 MiB of double-buffered f32 VMEM; amortizes ~0.35us/step
    _TARGET_GRID_STEPS = 4       # >=2 steps per TensorCore on v7x (2 TC/chip) for megacore sharding
    _MIN_PALLAS_BYTES = 8 << 20  # below this, the plain XLA dot is as fast and fuses with neighbors

    def __init__(self, shape, *, min_pallas_bytes=None, max_tb=None):
        self._shape = tuple(int(s) for s in shape)
        assert len(self._shape) > 0
        self._min_pallas_bytes = (self._MIN_PALLAS_BYTES if min_pallas_bytes is None
                                  else int(min_pallas_bytes))
        self._max_tb = self._MAX_TB if max_tb is None else int(max_tb)
        self._M = [_make_moment_matrix(l) for l in self._shape]
        self._invM = [np.linalg.inv(m) for m in self._M]   # kept for parity with _MK buffers
        # Combined operator: kron of the per-axis moment matrices, built in f64 on host and
        # applied in f32 on TPU (no f64 hardware).  m_flat = k_flat @ W^T, so store W^T.
        W = reduce(np.kron, self._M)                        # (N, N), N = prod(shape)
        self._WT = jnp.asarray(W.T, dtype=jnp.float32)

    def __call__(self, k: jax.Array) -> jax.Array:
        shape = self._shape
        d = len(shape)
        assert k.ndim >= d and tuple(k.shape[-d:]) == shape
        sizek = k.shape
        N = int(np.prod(shape))

        # _packdim: flatten leading dims to a batch axis (if k.ndim == d, B = 1).
        lead = sizek[:-d] if k.ndim > d else (1,)
        B = int(np.prod(lead)) if len(lead) > 0 else 1
        out_dtype = k.dtype
        itemsize = jnp.dtype(out_dtype).itemsize

        k_flat = jnp.reshape(k, (B, N))
        total_bytes = B * N * itemsize

        if total_bytes < self._min_pallas_bytes or B < self._TB_ALIGN:
            # Small problem: custom-call launch + grid overhead would dominate the ~1 HBM pass of
            # work; let XLA handle (and fuse) the tiny dot.
            m_flat = jnp.dot(
                k_flat.astype(jnp.float32), self._WT,
                preferred_element_type=jnp.float32,
            ).astype(out_dtype)
            return jnp.reshape(m_flat, sizek)

        # Batch-tile size: biggest tile <= _MAX_TB that still leaves >= _TARGET_GRID_STEPS grid
        # steps, so v7x's two TensorCores both get work and each core has >=2 steps to pipeline.
        tb_cap = max(self._TB_ALIGN,
                     _round_down(B // self._TARGET_GRID_STEPS, self._TB_ALIGN))
        TB = min(self._max_tb, tb_cap, _round_up(B, self._TB_ALIGN))
        grid = (pl.cdiv(B, TB),)
        # Partial last block is safe: each output row depends only on the same input row, so
        # garbage rows read past B never reach the (masked) in-bounds stores.

        # VMEM budget: in + out double-buffered (lane dim pads to 128) + resident W^T + headroom.
        lane_pad = _round_up(N, 128)
        vmem_need = 4 * TB * lane_pad * 4 + 2 * _round_up(N, 8) * lane_pad * 4 + (4 << 20)
        vmem_limit = int(min(64 << 20, max(32 << 20, vmem_need)))   # lifts v5e's 16 MiB default

        m_flat = pl.pallas_call(
            _k2m_kernel,
            out_shape=jax.ShapeDtypeStruct((B, N), out_dtype),
            grid=grid,
            in_specs=[
                pl.BlockSpec((N, N), lambda i: (0, 0)),     # W^T stays VMEM-resident
                pl.BlockSpec((TB, N), lambda i: (i, 0)),    # contiguous HBM slab per step
            ],
            out_specs=pl.BlockSpec((TB, N), lambda i: (i, 0)),
            compiler_params=pltpu.CompilerParams(
                dimension_semantics=("parallel",),           # independent batch tiles
                vmem_limit_bytes=vmem_limit,
            ),
            cost_estimate=pl.CostEstimate(
                flops=2 * N * N * B,
                transcendentals=0,
                bytes_accessed=2 * B * N * itemsize + N * N * 4,
            ),
        )(self._WT, k_flat)

        return jnp.reshape(m_flat, sizek)


if __name__ == "__main__":
    shape = (5, 5)
    key = jax.random.PRNGKey(0)
    k_small_key, k_big_key = jax.random.split(key)

    k2m = K2M(shape)
    # Pure-JAX reference of the exact PyTorch semantics (axis-wise left-dot).
    M0 = jnp.asarray(k2m._M[0], dtype=jnp.float32)
    M1 = jnp.asarray(k2m._M[1], dtype=jnp.float32)

    # 1) Small conv-weight-like tensor -> byte-gated XLA fallback path (overhead > work).
    k_small = jax.random.normal(k_small_key, (4, 8) + shape, dtype=jnp.float32)
    m_small = jax.block_until_ready(k2m(k_small))
    ref_small = jnp.einsum("ip,jq,...pq->...ij", M0, M1, k_small)
    assert m_small.shape == k_small.shape and m_small.dtype == k_small.dtype
    np.testing.assert_allclose(np.asarray(m_small), np.asarray(ref_small), rtol=1e-5, atol=1e-5)

    # 2) Larger conv-weight-like tensor with the Pallas path forced (threshold override) so the
    #    TPU kernel is exercised: B = 64*64 = 4096 -> TB = 1024, 4 "parallel" grid steps.
    k2m_pallas = K2M(shape, min_pallas_bytes=0)
    k_big = jax.random.normal(k_big_key, (64, 64) + shape, dtype=jnp.float32)
    m_big = jax.block_until_ready(k2m_pallas(k_big))
    ref_big = jnp.einsum("ip,jq,...pq->...ij", M0, M1, k_big)
    assert m_big.shape == k_big.shape and m_big.dtype == k_big.dtype
    np.testing.assert_allclose(np.asarray(m_big), np.asarray(ref_big), rtol=1e-5, atol=1e-5)

    print("KERNEL_OK")
</pallas_src>

<mosaic_0001>
module attributes {stable_mosaic.version = 11 : i64} {
  func.func @_k2m_kernel(%arg0: i32, %arg1: memref<25x25xf32, #tpu.memory_space<vmem>>, %arg2: memref<1024x25xf32, #tpu.memory_space<vmem>>, %arg3: memref<1024x25xf32, #tpu.memory_space<vmem>>) attributes {dimension_semantics = [#tpu.dimension_semantics<parallel>], iteration_bounds = array<i64: 4>, scalar_prefetch = 0 : i64, scratch_operands = 0 : i64, tpu.core_type = #tpu.core_type<tc>, window_params = [{pipeline_mode = #tpu.pipeline_mode<synchronous>, transform_indices = @transform_0, window_bounds = array<i64: 25, 25>}, {transform_indices = @transform_1, window_bounds = array<i64: 1024, 25>}, {transform_indices = @transform_2, window_bounds = array<i64: 1024, 25>}]} {
    %c0 = arith.constant 0 : index
    %c0_0 = arith.constant 0 : index
    %0 = vector.load %arg2[%c0, %c0_0] : memref<1024x25xf32, #tpu.memory_space<vmem>>, vector<1024x25xf32>
    %c0_1 = arith.constant 0 : index
    %c0_2 = arith.constant 0 : index
    %1 = vector.load %arg1[%c0_1, %c0_2] : memref<25x25xf32, #tpu.memory_space<vmem>>, vector<25x25xf32>
    %cst = arith.constant dense<0.000000e+00> : vector<1024x25xf32>
    %2 = tpu.matmul %0, %1, %cst {dimension_numbers = #tpu.dot_dimension_numbers<[1], [0], [0], [1], [0, 0, 1, 1], [], []>} : vector<1024x25xf32>, vector<25x25xf32>, vector<1024x25xf32> -> vector<1024x25xf32>
    %c0_3 = arith.constant 0 : index
    %c0_4 = arith.constant 0 : index
    %3 = vector.load %arg3[%c0_3, %c0_4] : memref<1024x25xf32, #tpu.memory_space<vmem>>, vector<1024x25xf32>
    tpu.vector_store %arg3[%c0_3, %c0_4], %2 {strides = array<i32>} : memref<1024x25xf32, #tpu.memory_space<vmem>>, vector<1024x25xf32>,
    return
  }
  func.func @transform_0(%arg0: i32) -> (i32, i32) {
    %c0_i32 = arith.constant 0 : i32
    %c0_i32_0 = arith.constant 0 : i32
    %c0_i32_1 = arith.constant 0 : i32
    return %c0_i32, %c0_i32_0 : i32, i32
  }
  func.func @transform_1(%arg0: i32) -> (i32, i32) {
    %c0_i32 = arith.constant 0 : i32
    %c0_i32_0 = arith.constant 0 : i32
    return %arg0, %c0_i32 : i32, i32
  }
  func.func @transform_2(%arg0: i32) -> (i32, i32) {
    %c0_i32 = arith.constant 0 : i32
    %c0_i32_0 = arith.constant 0 : i32
    return %arg0, %c0_i32 : i32, i32
  }
}

</mosaic_0001>

<bundles_post_ra>
// kernel: tpu_custom_call.1
= control target key start
LH: loop header
LB: loop body
LE: loop exit
PB: predicated region body
PF: predicated region fallthrough
CT: control target
= control target key end

     0   :  { %s1436_s9 = smov 0   ;;  %s1988_s0 = inlined_call_operand.vmem [shape: f32[25,25], index: 0, kind: input, shape index: {}]   ;;  %s1989_s1 = inlined_call_operand.vmem [shape: f32[4096,25], index: 1, kind: input, shape index: {}]   ;;  %s1990_s2 = inlined_call_operand.vmem [shape: f32[4096,25], index: 2, kind: output, shape index: {}]  }
   0x1 LB: > { %s1253_s10 = sadd.s32 4294967295, %s1419_s9   ;;  %p1257_p0 = scmp.ge.s32.totalorder %s1419_s9, 1  ;;  %s1419_s9 = sphi %s1436_s9, %s12_s9  }
   0x2   : > { %p113_p1 = scmp.lt.s32.totalorder %s1419_s9, 5 }
   0x4   : > { %p114_p2 = pnand %p1257_p0, %p113_p1 }
   0x5   : > { %s1258_s15 = sshll.u32 (!%p114_p2), %s1253_s10, 7 }
   0x6   : > { %117 = sbr.rel (%p114_p2) target bundleno = 401 (0x191), region = 28  ;;  %p136_p3 = scmp.lt.s32.totalorder (!%p114_p2), %s1258_s15, 511 }
   0xb   : > { %v278_v0 = vld [vmem:[%s1988_s0 + $0x18] sm:$0x1]  ;;  %vm664_vm0 = vcmask 1040384   ;;  %v277_v1 = vld [vmem:[%s1988_s0 + $0x10] sm:$0xff]  ;;  %v276_v2 = vld [vmem:[%s1988_s0 + $0x8] sm:$0xff]  ;;  %s1992_s15 = smov (!%p136_p3, %s1258_s15), 511 }
   0xc   : > { %1394 = vmatpush.msk.msra.mxu2 %vm664_vm0, %v278_v0  ;;  %1395 = vmatpush.msk.msra.mxu3 %vm664_vm0, %v278_v0  ;;  %v275_v3 = vld [vmem:[%s1988_s0] sm:$0xff]  ;;  %s1259_s20 = sshll.u32 %s1992_s15, 3  ;;  %vm279_vm1 = vcmask 203776  }
   0xd   : > { %1262 = vmatpush.msk.msra.mxu0 %vm664_vm0, %v278_v0  ;;  %1393 = vmatpush.msk.msra.mxu1 %vm664_vm0, %v278_v0  ;;  %s1464_s23 = scalar_lea.vmem %s1989_s1, %s1259_s20  ;;  %s1601_s26 = scalar_lea.vmem %s1990_s2, %s1259_s20 }
   0xe   : > { %1397 = vmatpush.msra.mxu2 %v277_v1  ;;  %1398 = vmatpush.msra.mxu3 %v277_v1  ;;  %v211_v4 = vld [vmem:[%s1464_s23 + $0x200] sm:$0xff]  ;;  %v212_v8 = vld [vmem:[%s1464_s23 + $0x208] sm:$0xff]  ;;  %v213_v12 = vld [vmem:[%s1464_s23 + $0x210] sm:$0xff] }
   0xf   : > { %681 = vmatpush.msra.mxu0 %v277_v1  ;;  %1396 = vmatpush.msra.mxu1 %v277_v1  ;;  %v243_v5 = vld [vmem:[%s1464_s23 + $0x300] sm:$0xff]  ;;  %v244_v9 = vld [vmem:[%s1464_s23 + $0x308] sm:$0xff]  ;;  %v245_v13 = vld [vmem:[%s1464_s23 + $0x310] sm:$0xff] }
  0x10   : > { %1400 = vmatpush.msra.mxu2 %v276_v2  ;;  %1401 = vmatpush.msra.mxu3 %v276_v2  ;;  %v147_v6 = vld [vmem:[%s1464_s23] sm:$0xff]  ;;  %v148_v10 = vld [vmem:[%s1464_s23 + $0x8] sm:$0xff]  ;;  %v149_v14 = vld [vmem:[%s1464_s23 + $0x10] sm:$0xff] }
  0x11   : > { %682 = vmatpush.msra.mxu0 %v276_v2  ;;  %1399 = vmatpush.msra.mxu1 %v276_v2  ;;  %v179_v7 = vld [vmem:[%s1464_s23 + $0x100] sm:$0xff]  ;;  %v180_v11 = vld [vmem:[%s1464_s23 + $0x108] sm:$0xff]  ;;  %v181_v15 = vld [vmem:[%s1464_s23 + $0x110] sm:$0xff] }
  0x12   : > { %1403 = vmatpush.msra.mxu2 %v275_v3  ;;  %1404 = vmatpush.msra.mxu3 %v275_v3  ;;  %v214_v16 = vld [vmem:[%s1464_s23 + $0x218] sm:$0xff]  ;;  %v215_v20 = vld [vmem:[%s1464_s23 + $0x220] sm:$0xff]  ;;  %v216_v24 = vld [vmem:[%s1464_s23 + $0x228] sm:$0xff] }
  0x13   : > { %1327 = vmatmul.msk.f32.vlgmr.msra.gmra.mxu2 %vm279_vm1, %v211_v4  ;;  %1359 = vmatmul.msk.f32.vlgmr.msra.gmra.mxu3 %vm279_vm1, %v243_v5  ;;  %v246_v17 = vld [vmem:[%s1464_s23 + $0x318] sm:$0xff]  ;;  %v247_v21 = vld [vmem:[%s1464_s23 + $0x320] sm:$0xff]  ;;  %v248_v25 = vld [vmem:[%s1464_s23 + $0x328] sm:$0xff] }
  0x14   : > { %683 = vmatpush.msra.mxu0 %v275_v3  ;;  %1402 = vmatpush.msra.mxu1 %v275_v3  ;;  %v150_v18 = vld [vmem:[%s1464_s23 + $0x18] sm:$0xff]  ;;  %v151_v22 = vld [vmem:[%s1464_s23 + $0x20] sm:$0xff]  ;;  %v152_v26 = vld [vmem:[%s1464_s23 + $0x28] sm:$0xff] }
  0x15   : > { %1263 = vmatmul.msk.f32.vlgmr.msra.gmra.mxu0 %vm279_vm1, %v147_v6  ;;  %1295 = vmatmul.msk.f32.vlgmr.msra.gmra.mxu1 %vm279_vm1, %v179_v7  ;;  %v182_v19 = vld [vmem:[%s1464_s23 + $0x118] sm:$0xff]  ;;  %v183_v23 = vld [vmem:[%s1464_s23 + $0x120] sm:$0xff]  ;;  %v184_v27 = vld [vmem:[%s1464_s23 + $0x128] sm:$0xff] }
  0x16   : > { %v217_v28 = vld [vmem:[%s1464_s23 + $0x230] sm:$0xff]  ;;  %v218_v32 = vld [vmem:[%s1464_s23 + $0x238] sm:$0xff]  ;;  %v219_v36 = vld [vmem:[%s1464_s23 + $0x240] sm:$0xff] }
  0x17   : > { %v249_v29 = vld [vmem:[%s1464_s23 + $0x330] sm:$0xff]  ;;  %v250_v33 = vld [vmem:[%s1464_s23 + $0x338] sm:$0xff]  ;;  %v251_v37 = vld [vmem:[%s1464_s23 + $0x340] sm:$0xff] }
  0x18   : > { %v153_v30 = vld [vmem:[%s1464_s23 + $0x30] sm:$0xff]  ;;  %v154_v34 = vld [vmem:[%s1464_s23 + $0x38] sm:$0xff]  ;;  %v155_v38 = vld [vmem:[%s1464_s23 + $0x40] sm:$0xff] }
  0x19   : > { %v185_v31 = vld [vmem:[%s1464_s23 + $0x130] sm:$0xff]  ;;  %v186_v35 = vld [vmem:[%s1464_s23 + $0x138] sm:$0xff]  ;;  %v187_v39 = vld [vmem:[%s1464_s23 + $0x140] sm:$0xff] }
  0x1a   : > { %v220_v40 = vld [vmem:[%s1464_s23 + $0x248] sm:$0xff]  ;;  %v221_v44 = vld [vmem:[%s1464_s23 + $0x250] sm:$0xff]  ;;  %v222_v48 = vld [vmem:[%s1464_s23 + $0x258] sm:$0xff] }
  0x1b   : > { %1328 = vmatmul.msk.f32.gmra.mxu2 %vm279_vm1, %v212_v8  ;;  %1360 = vmatmul.msk.f32.gmra.mxu3 %vm279_vm1, %v244_v9  ;;  %v252_v41 = vld [vmem:[%s1464_s23 + $0x348] sm:$0xff]  ;;  %v253_v45 = vld [vmem:[%s1464_s23 + $0x350] sm:$0xff]  ;;  %v254_v49 = vld [vmem:[%s1464_s23 + $0x358] sm:$0xff] }
  0x1c   : > { %v156_v42 = vld [vmem:[%s1464_s23 + $0x48] sm:$0xff]  ;;  %v157_v46 = vld [vmem:[%s1464_s23 + $0x50] sm:$0xff]  ;;  %v158_v50 = vld [vmem:[%s1464_s23 + $0x58] sm:$0xff] }
  0x1d   : > { %1264 = vmatmul.msk.f32.gmra.mxu0 %vm279_vm1, %v148_v10  ;;  %1296 = vmatmul.msk.f32.gmra.mxu1 %vm279_vm1, %v180_v11  ;;  %v188_v43 = vld [vmem:[%s1464_s23 + $0x148] sm:$0xff]  ;;  %v189_v47 = vld [vmem:[%s1464_s23 + $0x150] sm:$0xff]  ;;  %v190_v51 = vld [vmem:[%s1464_s23 + $0x158] sm:$0xff] }
  0x1e   : > { %v223_v52 = vld [vmem:[%s1464_s23 + $0x260] sm:$0xff]  ;;  %v224_v56 = vld [vmem:[%s1464_s23 + $0x268] sm:$0xff]  ;;  %v225_v60 = vld [vmem:[%s1464_s23 + $0x270] sm:$0xff] }
  0x1f   : > { %v255_v53 = vld [vmem:[%s1464_s23 + $0x360] sm:$0xff]  ;;  %v256_v57 = vld [vmem:[%s1464_s23 + $0x368] sm:$0xff]  ;;  %v257_v61 = vld [vmem:[%s1464_s23 + $0x370] sm:$0xff] }
  0x20   : > { %v159_v54 = vld [vmem:[%s1464_s23 + $0x60] sm:$0xff]  ;;  %v160_v58 = vld [vmem:[%s1464_s23 + $0x68] sm:$0xff]  ;;  %v161_v62 = vld [vmem:[%s1464_s23 + $0x70] sm:$0xff] }
  0x21   : > { %v191_v55 = vld [vmem:[%s1464_s23 + $0x160] sm:$0xff]  ;;  %v192_v59 = vld [vmem:[%s1464_s23 + $0x168] sm:$0xff]  ;;  %v193_v63 = vld [vmem:[%s1464_s23 + $0x170] sm:$0xff] }
  0x22   : > { %v226_v0 = vld [vmem:[%s1464_s23 + $0x278] sm:$0xff]  ;;  %v227_v4 = vld [vmem:[%s1464_s23 + $0x280] sm:$0xff] }
  0x23   : > { %1329 = vmatmul.msk.f32.gmra.mxu2 %vm279_vm1, %v213_v12  ;;  %1361 = vmatmul.msk.f32.gmra.mxu3 %vm279_vm1, %v245_v13  ;;  %v258_v1 = vld [vmem:[%s1464_s23 + $0x378] sm:$0xff]  ;;  %v259_v5 = vld [vmem:[%s1464_s23 + $0x380] sm:$0xff]  ;;  %v228_v12 = vld [vmem:[%s1464_s23 + $0x288] sm:$0xff] }
  0x24   : > { %v162_v2 = vld [vmem:[%s1464_s23 + $0x78] sm:$0xff]  ;;  %v163_v8 = vld [vmem:[%s1464_s23 + $0x80] sm:$0xff]  ;;  %v260_v13 = vld [vmem:[%s1464_s23 + $0x388] sm:$0xff] }
  0x25   : > { %1265 = vmatmul.msk.f32.gmra.mxu0 %vm279_vm1, %v149_v14  ;;  %1297 = vmatmul.msk.f32.gmra.mxu1 %vm279_vm1, %v181_v15  ;;  %v194_v3 = vld [vmem:[%s1464_s23 + $0x178] sm:$0xff]  ;;  %v195_v9 = vld [vmem:[%s1464_s23 + $0x180] sm:$0xff] }
  0x2b   : > { %1330 = vmatmul.msk.f32.gmra.mxu2 %vm279_vm1, %v214_v16  ;;  %1362 = vmatmul.msk.f32.gmra.mxu3 %vm279_vm1, %v246_v17  ;;  %v164_v16 = vld [vmem:[%s1464_s23 + $0x88] sm:$0xff] }
  0x2c   : > { %v196_v17 = vld [vmem:[%s1464_s23 + $0x188] sm:$0xff] }
  0x2d   : > { %1266 = vmatmul.msk.f32.gmra.mxu0 %vm279_vm1, %v150_v18  ;;  %1298 = vmatmul.msk.f32.gmra.mxu1 %vm279_vm1, %v182_v19 }
  0x33   : > { %1331 = vmatmul.msk.f32.gmra.mxu2 %vm279_vm1, %v215_v20  ;;  %1363 = vmatmul.msk.f32.gmra.mxu3 %vm279_vm1, %v247_v21  ;;  %v229_v20 = vld [vmem:[%s1464_s23 + $0x290] sm:$0xff] }
  0x34   : > { %v261_v21 = vld [vmem:[%s1464_s23 + $0x390] sm:$0xff] }
  0x35   : > { %1267 = vmatmul.msk.f32.gmra.mxu0 %vm279_vm1, %v151_v22  ;;  %1299 = vmatmul.msk.f32.gmra.mxu1 %vm279_vm1, %v183_v23 }
  0x3b   : > { %1332 = vmatmul.msk.f32.gmra.mxu2 %vm279_vm1, %v216_v24  ;;  %1364 = vmatmul.msk.f32.gmra.mxu3 %vm279_vm1, %v248_v25  ;;  %v165_v24 = vld [vmem:[%s1464_s23 + $0x90] sm:$0xff] }
  0x3c   : > { %v197_v25 = vld [vmem:[%s1464_s23 + $0x190] sm:$0xff] }
  0x3d   : > { %1268 = vmatmul.msk.f32.gmra.mxu0 %vm279_vm1, %v152_v26  ;;  %1300 = vmatmul.msk.f32.gmra.mxu1 %vm279_vm1, %v184_v27 }
  0x43   : > { %1333 = vmatmul.msk.f32.gmra.mxu2 %vm279_vm1, %v217_v28  ;;  %1365 = vmatmul.msk.f32.gmra.mxu3 %vm279_vm1, %v249_v29  ;;  %v230_v28 = vld [vmem:[%s1464_s23 + $0x298] sm:$0xff] }
  0x44   : > { %v262_v29 = vld [vmem:[%s1464_s23 + $0x398] sm:$0xff] }
  0x45   : > { %1269 = vmatmul.msk.f32.gmra.mxu0 %vm279_vm1, %v153_v30  ;;  %1301 = vmatmul.msk.f32.gmra.mxu1 %vm279_vm1, %v185_v31 }
  0x4b   : > { %1334 = vmatmul.msk.f32.gmra.mxu2 %vm279_vm1, %v218_v32  ;;  %1366 = vmatmul.msk.f32.gmra.mxu3 %vm279_vm1, %v250_v33  ;;  %v166_v32 = vld [vmem:[%s1464_s23 + $0x98] sm:$0xff] }
  0x4c   : > { %v198_v33 = vld [vmem:[%s1464_s23 + $0x198] sm:$0xff] }
  0x4d   : > { %1270 = vmatmul.msk.f32.gmra.mxu0 %vm279_vm1, %v154_v34  ;;  %1302 = vmatmul.msk.f32.gmra.mxu1 %vm279_vm1, %v186_v35 }
  0x53   : > { %1335 = vmatmul.msk.f32.gmra.mxu2 %vm279_vm1, %v219_v36  ;;  %1367 = vmatmul.msk.f32.gmra.mxu3 %vm279_vm1, %v251_v37  ;;  %v231_v36 = vld [vmem:[%s1464_s23 + $0x2a0] sm:$0xff] }
  0x54   : > { %v263_v37 = vld [vmem:[%s1464_s23 + $0x3a0] sm:$0xff] }
  0x55   : > { %1271 = vmatmul.msk.f32.gmra.mxu0 %vm279_vm1, %v155_v38  ;;  %1303 = vmatmul.msk.f32.gmra.mxu1 %vm279_vm1, %v187_v39 }
  0x5b   : > { %1336 = vmatmul.msk.f32.gmra.mxu2 %vm279_vm1, %v220_v40  ;;  %1368 = vmatmul.msk.f32.gmra.mxu3 %vm279_vm1, %v252_v41  ;;  %v167_v40 = vld [vmem:[%s1464_s23 + $0xa0] sm:$0xff] }
  0x5c   : > { %v199_v41 = vld [vmem:[%s1464_s23 + $0x1a0] sm:$0xff] }
  0x5d   : > { %1272 = vmatmul.msk.f32.gmra.mxu0 %vm279_vm1, %v156_v42  ;;  %1304 = vmatmul.msk.f32.gmra.mxu1 %vm279_vm1, %v188_v43 }
  0x63   : > { %1337 = vmatmul.msk.f32.gmra.mxu2 %vm279_vm1, %v221_v44  ;;  %1369 = vmatmul.msk.f32.gmra.mxu3 %vm279_vm1, %v253_v45  ;;  %v232_v44 = vld [vmem:[%s1464_s23 + $0x2a8] sm:$0xff] }
  0x64   : > { %v264_v45 = vld [vmem:[%s1464_s23 + $0x3a8] sm:$0xff] }
  0x65   : > { %1273 = vmatmul.msk.f32.gmra.mxu0 %vm279_vm1, %v157_v46  ;;  %1305 = vmatmul.msk.f32.gmra.mxu1 %vm279_vm1, %v189_v47 }
  0x6b   : > { %1338 = vmatmul.msk.f32.gmra.mxu2 %vm279_vm1, %v222_v48  ;;  %1370 = vmatmul.msk.f32.gmra.mxu3 %vm279_vm1, %v254_v49  ;;  %v168_v48 = vld [vmem:[%s1464_s23 + $0xa8] sm:$0xff] }
  0x6c   : > { %v200_v49 = vld [vmem:[%s1464_s23 + $0x1a8] sm:$0xff] }
  0x6d   : > { %1274 = vmatmul.msk.f32.gmra.mxu0 %vm279_vm1, %v158_v50  ;;  %1306 = vmatmul.msk.f32.gmra.mxu1 %vm279_vm1, %v190_v51 }
  0x73   : > { %1339 = vmatmul.msk.f32.gmra.mxu2 %vm279_vm1, %v223_v52  ;;  %1371 = vmatmul.msk.f32.gmra.mxu3 %vm279_vm1, %v255_v53  ;;  %v233_v52 = vld [vmem:[%s1464_s23 + $0x2b0] sm:$0xff] }
  0x74   : > { %v265_v53 = vld [vmem:[%s1464_s23 + $0x3b0] sm:$0xff] }
  0x75   : > { %1275 = vmatmul.msk.f32.gmra.mxu0 %vm279_vm1, %v159_v54  ;;  %1307 = vmatmul.msk.f32.gmra.mxu1 %vm279_vm1, %v191_v55 }
  0x7b   : > { %1340 = vmatmul.msk.f32.gmra.mxu2 %vm279_vm1, %v224_v56  ;;  %1372 = vmatmul.msk.f32.gmra.mxu3 %vm279_vm1, %v256_v57  ;;  %v169_v56 = vld [vmem:[%s1464_s23 + $0xb0] sm:$0xff] }
  0x7c   : > { %v201_v57 = vld [vmem:[%s1464_s23 + $0x1b0] sm:$0xff] }
  0x7d   : > { %1276 = vmatmul.msk.f32.gmra.mxu0 %vm279_vm1, %v160_v58  ;;  %1308 = vmatmul.msk.f32.gmra.mxu1 %vm279_vm1, %v192_v59 }
  0x83   : > { %1341 = vmatmul.msk.f32.gmra.mxu2 %vm279_vm1, %v225_v60  ;;  %1373 = vmatmul.msk.f32.gmra.mxu3 %vm279_vm1, %v257_v61  ;;  %v234_v60 = vld [vmem:[%s1464_s23 + $0x2b8] sm:$0xff] }
  0x84   : > { %v266_v61 = vld [vmem:[%s1464_s23 + $0x3b8] sm:$0xff] }
  0x85   : > { %1277 = vmatmul.msk.f32.gmra.mxu0 %vm279_vm1, %v161_v62  ;;  %1309 = vmatmul.msk.f32.gmra.mxu1 %vm279_vm1, %v193_v63 }
  0x8b   : > { %1342 = vmatmul.msk.f32.gmra.mxu2 %vm279_vm1, %v226_v0  ;;  %1374 = vmatmul.msk.f32.gmra.mxu3 %vm279_vm1, %v258_v1  ;;  %v170_v0 = vld [vmem:[%s1464_s23 + $0xb8] sm:$0xff] }
  0x8c   : > { %v202_v1 = vld [vmem:[%s1464_s23 + $0x1b8] sm:$0xff] }
  0x8d   : > { %1278 = vmatmul.msk.f32.gmra.mxu0 %vm279_vm1, %v162_v2  ;;  %1310 = vmatmul.msk.f32.gmra.mxu1 %vm279_vm1, %v194_v3 }
  0x92   : > { %v685_v6 = vpop.f32.mrf.mxu0  ;;  %v781_v7 = vpop.f32.mrf.mxu1 }
  0x93   : > { %1343 = vmatmul.msk.f32.gmra.mxu2 %vm279_vm1, %v227_v4  ;;  %1375 = vmatmul.msk.f32.gmra.mxu3 %vm279_vm1, %v259_v5  ;;  %1069 = vst.msk [vmem:[%s1601_s26] sm:$0xff] %vm279_vm1, %v685_v6  ;;  %v235_v4 = vld [vmem:[%s1464_s23 + $0x2c0] sm:$0xff] }
  0x94   : > { %1101 = vst.msk [vmem:[%s1601_s26 + $0x100] sm:$0xff] %vm279_vm1, %v781_v7  ;;  %v267_v5 = vld [vmem:[%s1464_s23 + $0x3c0] sm:$0xff] }
  0x95   : > { %1279 = vmatmul.msk.f32.gmra.mxu0 %vm279_vm1, %v163_v8  ;;  %1311 = vmatmul.msk.f32.gmra.mxu1 %vm279_vm1, %v195_v9  ;;  %v171_v8 = vld [vmem:[%s1464_s23 + $0xc0] sm:$0xff] }
  0x96   : > { %v877_v10 = vpop.f32.mrf.mxu2  ;;  %v973_v11 = vpop.f32.mrf.mxu3  ;;  %v203_v9 = vld [vmem:[%s1464_s23 + $0x1c0] sm:$0xff] }
  0x97   : > { %1133 = vst.msk [vmem:[%s1601_s26 + $0x200] sm:$0xff] %vm279_vm1, %v877_v10 }
  0x98   : > { %1165 = vst.msk [vmem:[%s1601_s26 + $0x300] sm:$0xff] %vm279_vm1, %v973_v11 }
  0x9a   : > { %v688_v14 = vpop.f32.mrf.mxu0  ;;  %v784_v15 = vpop.f32.mrf.mxu1 }
  0x9b   : > { %1344 = vmatmul.msk.f32.gmra.mxu2 %vm279_vm1, %v228_v12  ;;  %1376 = vmatmul.msk.f32.gmra.mxu3 %vm279_vm1, %v260_v13  ;;  %1070 = vst.msk [vmem:[%s1601_s26 + $0x8] sm:$0xff] %vm279_vm1, %v688_v14  ;;  %v236_v12 = vld [vmem:[%s1464_s23 + $0x2c8] sm:$0xff] }
  0x9c   : > { %1102 = vst.msk [vmem:[%s1601_s26 + $0x108] sm:$0xff] %vm279_vm1, %v784_v15  ;;  %v268_v13 = vld [vmem:[%s1464_s23 + $0x3c8] sm:$0xff] }
  0x9d   : > { %1280 = vmatmul.msk.f32.gmra.mxu0 %vm279_vm1, %v164_v16  ;;  %1312 = vmatmul.msk.f32.gmra.mxu1 %vm279_vm1, %v196_v17  ;;  %v172_v16 = vld [vmem:[%s1464_s23 + $0xc8] sm:$0xff] }
  0x9e   : > { %v880_v18 = vpop.f32.mrf.mxu2  ;;  %v976_v19 = vpop.f32.mrf.mxu3  ;;  %v204_v17 = vld [vmem:[%s1464_s23 + $0x1c8] sm:$0xff] }
  0x9f   : > { %1134 = vst.msk [vmem:[%s1601_s26 + $0x208] sm:$0xff] %vm279_vm1, %v880_v18 }
  0xa0   : > { %1166 = vst.msk [vmem:[%s1601_s26 + $0x308] sm:$0xff] %vm279_vm1, %v976_v19 }
  0xa2   : > { %v691_v22 = vpop.f32.mrf.mxu0  ;;  %v787_v23 = vpop.f32.mrf.mxu1 }
  0xa3   : > { %1345 = vmatmul.msk.f32.gmra.mxu2 %vm279_vm1, %v229_v20  ;;  %1377 = vmatmul.msk.f32.gmra.mxu3 %vm279_vm1, %v261_v21  ;;  %1071 = vst.msk [vmem:[%s1601_s26 + $0x10] sm:$0xff] %vm279_vm1, %v691_v22  ;;  %v237_v20 = vld [vmem:[%s1464_s23 + $0x2d0] sm:$0xff] }
  0xa4   : > { %1103 = vst.msk [vmem:[%s1601_s26 + $0x110] sm:$0xff] %vm279_vm1, %v787_v23  ;;  %v269_v21 = vld [vmem:[%s1464_s23 + $0x3d0] sm:$0xff] }
  0xa5   : > { %1281 = vmatmul.msk.f32.gmra.mxu0 %vm279_vm1, %v165_v24  ;;  %1313 = vmatmul.msk.f32.gmra.mxu1 %vm279_vm1, %v197_v25  ;;  %v173_v24 = vld [vmem:[%s1464_s23 + $0xd0] sm:$0xff] }
  0xa6   : > { %v883_v26 = vpop.f32.mrf.mxu2  ;;  %v979_v27 = vpop.f32.mrf.mxu3  ;;  %v205_v25 = vld [vmem:[%s1464_s23 + $0x1d0] sm:$0xff] }
  0xa7   : > { %1135 = vst.msk [vmem:[%s1601_s26 + $0x210] sm:$0xff] %vm279_vm1, %v883_v26 }
  0xa8   : > { %1167 = vst.msk [vmem:[%s1601_s26 + $0x310] sm:$0xff] %vm279_vm1, %v979_v27 }
  0xaa   : > { %v694_v30 = vpop.f32.mrf.mxu0  ;;  %v790_v31 = vpop.f32.mrf.mxu1 }
  0xab   : > { %1346 = vmatmul.msk.f32.gmra.mxu2 %vm279_vm1, %v230_v28  ;;  %1378 = vmatmul.msk.f32.gmra.mxu3 %vm279_vm1, %v262_v29  ;;  %1072 = vst.msk [vmem:[%s1601_s26 + $0x18] sm:$0xff] %vm279_vm1, %v694_v30  ;;  %v238_v28 = vld [vmem:[%s1464_s23 + $0x2d8] sm:$0xff] }
  0xac   : > { %1104 = vst.msk [vmem:[%s1601_s26 + $0x118] sm:$0xff] %vm279_vm1, %v790_v31  ;;  %v270_v29 = vld [vmem:[%s1464_s23 + $0x3d8] sm:$0xff] }
  0xad   : > { %1282 = vmatmul.msk.f32.gmra.mxu0 %vm279_vm1, %v166_v32  ;;  %1314 = vmatmul.msk.f32.gmra.mxu1 %vm279_vm1, %v198_v33  ;;  %v174_v32 = vld [vmem:[%s1464_s23 + $0xd8] sm:$0xff] }
  0xae   : > { %v886_v34 = vpop.f32.mrf.mxu2  ;;  %v982_v35 = vpop.f32.mrf.mxu3  ;;  %v206_v33 = vld [vmem:[%s1464_s23 + $0x1d8] sm:$0xff] }
  0xaf   : > { %1136 = vst.msk [vmem:[%s1601_s26 + $0x218] sm:$0xff] %vm279_vm1, %v886_v34 }
  0xb0   : > { %1168 = vst.msk [vmem:[%s1601_s26 + $0x318] sm:$0xff] %vm279_vm1, %v982_v35 }
  0xb2   : > { %v697_v38 = vpop.f32.mrf.mxu0  ;;  %v793_v39 = vpop.f32.mrf.mxu1 }
  0xb3   : > { %1347 = vmatmul.msk.f32.gmra.mxu2 %vm279_vm1, %v231_v36  ;;  %1379 = vmatmul.msk.f32.gmra.mxu3 %vm279_vm1, %v263_v37  ;;  %1073 = vst.msk [vmem:[%s1601_s26 + $0x20] sm:$0xff] %vm279_vm1, %v697_v38  ;;  %v239_v36 = vld [vmem:[%s1464_s23 + $0x2e0] sm:$0xff] }
  0xb4   : > { %1105 = vst.msk [vmem:[%s1601_s26 + $0x120] sm:$0xff] %vm279_vm1, %v793_v39  ;;  %v271_v37 = vld [vmem:[%s1464_s23 + $0x3e0] sm:$0xff] }
  0xb5   : > { %1283 = vmatmul.msk.f32.gmra.mxu0 %vm279_vm1, %v167_v40  ;;  %1315 = vmatmul.msk.f32.gmra.mxu1 %vm279_vm1, %v199_v41  ;;  %v175_v40 = vld [vmem:[%s1464_s23 + $0xe0] sm:$0xff] }
  0xb6   : > { %v889_v42 = vpop.f32.mrf.mxu2  ;;  %v985_v43 = vpop.f32.mrf.mxu3  ;;  %v207_v41 = vld [vmem:[%s1464_s23 + $0x1e0] sm:$0xff] }
  0xb7   : > { %1137 = vst.msk [vmem:[%s1601_s26 + $0x220] sm:$0xff] %vm279_vm1, %v889_v42 }
  0xb8   : > { %1169 = vst.msk [vmem:[%s1601_s26 + $0x320] sm:$0xff] %vm279_vm1, %v985_v43 }
  0xba   : > { %v700_v46 = vpop.f32.mrf.mxu0  ;;  %v796_v47 = vpop.f32.mrf.mxu1 }
  0xbb   : > { %1348 = vmatmul.msk.f32.gmra.mxu2 %vm279_vm1, %v232_v44  ;;  %1380 = vmatmul.msk.f32.gmra.mxu3 %vm279_vm1, %v264_v45  ;;  %1074 = vst.msk [vmem:[%s1601_s26 + $0x28] sm:$0xff] %vm279_vm1, %v700_v46  ;;  %v240_v44 = vld [vmem:[%s1464_s23 + $0x2e8] sm:$0xff] }
  0xbc   : > { %1106 = vst.msk [vmem:[%s1601_s26 + $0x128] sm:$0xff] %vm279_vm1, %v796_v47  ;;  %v272_v45 = vld [vmem:[%s1464_s23 + $0x3e8] sm:$0xff] }
  0xbd   : > { %1284 = vmatmul.msk.f32.gmra.mxu0 %vm279_vm1, %v168_v48  ;;  %1316 = vmatmul.msk.f32.gmra.mxu1 %vm279_vm1, %v200_v49  ;;  %v176_v48 = vld [vmem:[%s1464_s23 + $0xe8] sm:$0xff] }
  0xbe   : > { %v892_v50 = vpop.f32.mrf.mxu2  ;;  %v988_v51 = vpop.f32.mrf.mxu3  ;;  %v208_v49 = vld [vmem:[%s1464_s23 + $0x1e8] sm:$0xff] }
  0xbf   : > { %1138 = vst.msk [vmem:[%s1601_s26 + $0x228] sm:$0xff] %vm279_vm1, %v892_v50 }
  0xc0   : > { %1170 = vst.msk [vmem:[%s1601_s26 + $0x328] sm:$0xff] %vm279_vm1, %v988_v51 }
  0xc2   : > { %v703_v54 = vpop.f32.mrf.mxu0  ;;  %v799_v55 = vpop.f32.mrf.mxu1 }
  0xc3   : > { %1349 = vmatmul.msk.f32.gmra.mxu2 %vm279_vm1, %v233_v52  ;;  %1381 = vmatmul.msk.f32.gmra.mxu3 %vm279_vm1, %v265_v53  ;;  %1075 = vst.msk [vmem:[%s1601_s26 + $0x30] sm:$0xff] %vm279_vm1, %v703_v54  ;;  %v241_v52 = vld [vmem:[%s1464_s23 + $0x2f0] sm:$0xff] }
  0xc4   : > { %1107 = vst.msk [vmem:[%s1601_s26 + $0x130] sm:$0xff] %vm279_vm1, %v799_v55  ;;  %v273_v53 = vld [vmem:[%s1464_s23 + $0x3f0] sm:$0xff] }
  0xc5   : > { %1285 = vmatmul.msk.f32.gmra.mxu0 %vm279_vm1, %v169_v56  ;;  %1317 = vmatmul.msk.f32.gmra.mxu1 %vm279_vm1, %v201_v57  ;;  %v177_v56 = vld [vmem:[%s1464_s23 + $0xf0] sm:$0xff] }
  0xc6   : > { %v895_v58 = vpop.f32.mrf.mxu2  ;;  %v991_v59 = vpop.f32.mrf.mxu3  ;;  %v209_v57 = vld [vmem:[%s1464_s23 + $0x1f0] sm:$0xff] }
  0xc7   : > { %1139 = vst.msk [vmem:[%s1601_s26 + $0x230] sm:$0xff] %vm279_vm1, %v895_v58 }
  0xc8   : > { %1171 = vst.msk [vmem:[%s1601_s26 + $0x330] sm:$0xff] %vm279_vm1, %v991_v59 }
  0xca   : > { %v706_v62 = vpop.f32.mrf.mxu0  ;;  %v802_v63 = vpop.f32.mrf.mxu1 }
  0xcb   : > { %1350 = vmatmul.msk.f32.gmra.mxu2 %vm279_vm1, %v234_v60  ;;  %1382 = vmatmul.msk.f32.gmra.mxu3 %vm279_vm1, %v266_v61  ;;  %1076 = vst.msk [vmem:[%s1601_s26 + $0x38] sm:$0xff] %vm279_vm1, %v706_v62  ;;  %v242_v60 = vld [vmem:[%s1464_s23 + $0x2f8] sm:$0xff] }
  0xcc   : > { %1108 = vst.msk [vmem:[%s1601_s26 + $0x138] sm:$0xff] %vm279_vm1, %v802_v63  ;;  %v274_v61 = vld [vmem:[%s1464_s23 + $0x3f8] sm:$0xff] }
  0xcd   : > { %1286 = vmatmul.msk.f32.gmra.mxu0 %vm279_vm1, %v170_v0  ;;  %1318 = vmatmul.msk.f32.gmra.mxu1 %vm279_vm1, %v202_v1  ;;  %v178_v0 = vld [vmem:[%s1464_s23 + $0xf8] sm:$0xff] }
  0xce   : > { %v898_v2 = vpop.f32.mrf.mxu2  ;;  %v994_v3 = vpop.f32.mrf.mxu3  ;;  %v210_v1 = vld [vmem:[%s1464_s23 + $0x1f8] sm:$0xff] }
  0xcf   : > { %1140 = vst.msk [vmem:[%s1601_s26 + $0x238] sm:$0xff] %vm279_vm1, %v898_v2 }
  0xd0   : > { %1172 = vst.msk [vmem:[%s1601_s26 + $0x338] sm:$0xff] %vm279_vm1, %v994_v3 }
  0xd2   : > { %v709_v6 = vpop.f32.mrf.mxu0  ;;  %v805_v7 = vpop.f32.mrf.mxu1 }
  0xd3   : > { %1351 = vmatmul.msk.f32.gmra.mxu2 %vm279_vm1, %v235_v4  ;;  %1383 = vmatmul.msk.f32.gmra.mxu3 %vm279_vm1, %v267_v5  ;;  %1077 = vst.msk [vmem:[%s1601_s26 + $0x40] sm:$0xff] %vm279_vm1, %v709_v6 }
  0xd4   : > { %1109 = vst.msk [vmem:[%s1601_s26 + $0x140] sm:$0xff] %vm279_vm1, %v805_v7 }
  0xd5   : > { %1287 = vmatmul.msk.f32.gmra.mxu0 %vm279_vm1, %v171_v8  ;;  %1319 = vmatmul.msk.f32.gmra.mxu1 %vm279_vm1, %v203_v9 }
  0xd6   : > { %v901_v10 = vpop.f32.mrf.mxu2  ;;  %v997_v11 = vpop.f32.mrf.mxu3 }
  0xd7   : > { %1141 = vst.msk [vmem:[%s1601_s26 + $0x240] sm:$0xff] %vm279_vm1, %v901_v10 }
  0xd8   : > { %1173 = vst.msk [vmem:[%s1601_s26 + $0x340] sm:$0xff] %vm279_vm1, %v997_v11 }
  0xda   : > { %v712_v14 = vpop.f32.mrf.mxu0  ;;  %v808_v15 = vpop.f32.mrf.mxu1 }
  0xdb   : > { %1352 = vmatmul.msk.f32.gmra.mxu2 %vm279_vm1, %v236_v12  ;;  %1384 = vmatmul.msk.f32.gmra.mxu3 %vm279_vm1, %v268_v13  ;;  %1078 = vst.msk [vmem:[%s1601_s26 + $0x48] sm:$0xff] %vm279_vm1, %v712_v14 }
  0xdc   : > { %1110 = vst.msk [vmem:[%s1601_s26 + $0x148] sm:$0xff] %vm279_vm1, %v808_v15 }
  0xdd   : > { %1288 = vmatmul.msk.f32.gmra.mxu0 %vm279_vm1, %v172_v16  ;;  %1320 = vmatmul.msk.f32.gmra.mxu1 %vm279_vm1, %v204_v17 }
  0xde   : > { %v904_v18 = vpop.f32.mrf.mxu2  ;;  %v1000_v19 = vpop.f32.mrf.mxu3 }
  0xdf   : > { %1142 = vst.msk [vmem:[%s1601_s26 + $0x248] sm:$0xff] %vm279_vm1, %v904_v18 }
  0xe0   : > { %1174 = vst.msk [vmem:[%s1601_s26 + $0x348] sm:$0xff] %vm279_vm1, %v1000_v19 }
  0xe2   : > { %v715_v22 = vpop.f32.mrf.mxu0  ;;  %v811_v23 = vpop.f32.mrf.mxu1 }
  0xe3   : > { %1353 = vmatmul.msk.f32.gmra.mxu2 %vm279_vm1, %v237_v20  ;;  %1385 = vmatmul.msk.f32.gmra.mxu3 %vm279_vm1, %v269_v21  ;;  %1079 = vst.msk [vmem:[%s1601_s26 + $0x50] sm:$0xff] %vm279_vm1, %v715_v22 }
  0xe4   : > { %1111 = vst.msk [vmem:[%s1601_s26 + $0x150] sm:$0xff] %vm279_vm1, %v811_v23 }
  0xe5   : > { %1289 = vmatmul.msk.f32.gmra.mxu0 %vm279_vm1, %v173_v24  ;;  %1321 = vmatmul.msk.f32.gmra.mxu1 %vm279_vm1, %v205_v25 }
  0xe6   : > { %v907_v26 = vpop.f32.mrf.mxu2  ;;  %v1003_v27 = vpop.f32.mrf.mxu3 }
  0xe7   : > { %1143 = vst.msk [vmem:[%s1601_s26 + $0x250] sm:$0xff] %vm279_vm1, %v907_v26 }
  0xe8   : > { %1175 = vst.msk [vmem:[%s1601_s26 + $0x350] sm:$0xff] %vm279_vm1, %v1003_v27 }
  0xea   : > { %v718_v30 = vpop.f32.mrf.mxu0  ;;  %v814_v31 = vpop.f32.mrf.mxu1 }
  0xeb   : > { %1354 = vmatmul.msk.f32.gmra.mxu2 %vm279_vm1, %v238_v28  ;;  %1386 = vmatmul.msk.f32.gmra.mxu3 %vm279_vm1, %v270_v29  ;;  %1080 = vst.msk [vmem:[%s1601_s26 + $0x58] sm:$0xff] %vm279_vm1, %v718_v30 }
  0xec   : > { %1112 = vst.msk [vmem:[%s1601_s26 + $0x158] sm:$0xff] %vm279_vm1, %v814_v31 }
  0xed   : > { %1290 = vmatmul.msk.f32.gmra.mxu0 %vm279_vm1, %v174_v32  ;;  %1322 = vmatmul.msk.f32.gmra.mxu1 %vm279_vm1, %v206_v33 }
  0xee   : > { %v910_v34 = vpop.f32.mrf.mxu2  ;;  %v1006_v35 = vpop.f32.mrf.mxu3 }
  0xef   : > { %1144 = vst.msk [vmem:[%s1601_s26 + $0x258] sm:$0xff] %vm279_vm1, %v910_v34 }
  0xf0   : > { %1176 = vst.msk [vmem:[%s1601_s26 + $0x358] sm:$0xff] %vm279_vm1, %v1006_v35 }
  0xf2   : > { %v721_v38 = vpop.f32.mrf.mxu0  ;;  %v817_v39 = vpop.f32.mrf.mxu1 }
  0xf3   : > { %1355 = vmatmul.msk.f32.gmra.mxu2 %vm279_vm1, %v239_v36  ;;  %1387 = vmatmul.msk.f32.gmra.mxu3 %vm279_vm1, %v271_v37  ;;  %1081 = vst.msk [vmem:[%s1601_s26 + $0x60] sm:$0xff] %vm279_vm1, %v721_v38 }
  0xf4   : > { %1113 = vst.msk [vmem:[%s1601_s26 + $0x160] sm:$0xff] %vm279_vm1, %v817_v39 }
  0xf5   : > { %1291 = vmatmul.msk.f32.gmra.mxu0 %vm279_vm1, %v175_v40  ;;  %1323 = vmatmul.msk.f32.gmra.mxu1 %vm279_vm1, %v207_v41 }
  0xf6   : > { %v913_v42 = vpop.f32.mrf.mxu2  ;;  %v1009_v43 = vpop.f32.mrf.mxu3 }
  0xf7   : > { %1145 = vst.msk [vmem:[%s1601_s26 + $0x260] sm:$0xff] %vm279_vm1, %v913_v42 }
  0xf8   : > { %1177 = vst.msk [vmem:[%s1601_s26 + $0x360] sm:$0xff] %vm279_vm1, %v1009_v43 }
  0xfa   : > { %v724_v46 = vpop.f32.mrf.mxu0  ;;  %v820_v47 = vpop.f32.mrf.mxu1 }
  0xfb   : > { %1356 = vmatmul.msk.f32.gmra.mxu2 %vm279_vm1, %v240_v44  ;;  %1388 = vmatmul.msk.f32.gmra.mxu3 %vm279_vm1, %v272_v45  ;;  %1082 = vst.msk [vmem:[%s1601_s26 + $0x68] sm:$0xff] %vm279_vm1, %v724_v46 }
  0xfc   : > { %1114 = vst.msk [vmem:[%s1601_s26 + $0x168] sm:$0xff] %vm279_vm1, %v820_v47 }
  0xfd   : > { %1292 = vmatmul.msk.f32.gmra.mxu0 %vm279_vm1, %v176_v48  ;;  %1324 = vmatmul.msk.f32.gmra.mxu1 %vm279_vm1, %v208_v49 }
  0xfe   : > { %v916_v50 = vpop.f32.mrf.mxu2  ;;  %v1012_v51 = vpop.f32.mrf.mxu3 }
  0xff   : > { %1146 = vst.msk [vmem:[%s1601_s26 + $0x268] sm:$0xff] %vm279_vm1, %v916_v50 }
 0x100   : > { %1178 = vst.msk [vmem:[%s1601_s26 + $0x368] sm:$0xff] %vm279_vm1, %v1012_v51 }
 0x102   : > { %v727_v54 = vpop.f32.mrf.mxu0  ;;  %v823_v55 = vpop.f32.mrf.mxu1 }
 0x103   : > { %1357 = vmatmul.msk.f32.gmra.mxu2 %vm279_vm1, %v241_v52  ;;  %1389 = vmatmul.msk.f32.gmra.mxu3 %vm279_vm1, %v273_v53  ;;  %1083 = vst.msk [vmem:[%s1601_s26 + $0x70] sm:$0xff] %vm279_vm1, %v727_v54 }
 0x104   : > { %1115 = vst.msk [vmem:[%s1601_s26 + $0x170] sm:$0xff] %vm279_vm1, %v823_v55 }
 0x105   : > { %1293 = vmatmul.msk.f32.gmra.mxu0 %vm279_vm1, %v177_v56  ;;  %1325 = vmatmul.msk.f32.gmra.mxu1 %vm279_vm1, %v209_v57 }
 0x106   : > { %v919_v58 = vpop.f32.mrf.mxu2  ;;  %v1015_v59 = vpop.f32.mrf.mxu3 }
 0x107   : > { %1147 = vst.msk [vmem:[%s1601_s26 + $0x270] sm:$0xff] %vm279_vm1, %v919_v58 }
 0x108   : > { %1179 = vst.msk [vmem:[%s1601_s26 + $0x370] sm:$0xff] %vm279_vm1, %v1015_v59 }
 0x10a   : > { %v730_v62 = vpop.f32.mrf.mxu0  ;;  %v826_v63 = vpop.f32.mrf.mxu1 }
 0x10b   : > { %1358 = vmatmul.msk.f32.gmra.mxu2 %vm279_vm1, %v242_v60  ;;  %1390 = vmatmul.msk.f32.gmra.mxu3 %vm279_vm1, %v274_v61  ;;  %1084 = vst.msk [vmem:[%s1601_s26 + $0x78] sm:$0xff] %vm279_vm1, %v730_v62 }
 0x10c   : > { %1116 = vst.msk [vmem:[%s1601_s26 + $0x178] sm:$0xff] %vm279_vm1, %v826_v63 }
 0x10d   : > { %1294 = vmatmul.msk.f32.gmra.mxu0 %vm279_vm1, %v178_v0  ;;  %1326 = vmatmul.msk.f32.gmra.mxu1 %vm279_vm1, %v210_v1 }
 0x10e   : > { %v922_v2 = vpop.f32.mrf.mxu2  ;;  %v1018_v3 = vpop.f32.mrf.mxu3 }
 0x10f   : > { %1148 = vst.msk [vmem:[%s1601_s26 + $0x278] sm:$0xff] %vm279_vm1, %v922_v2 }
 0x110   : > { %1180 = vst.msk [vmem:[%s1601_s26 + $0x378] sm:$0xff] %vm279_vm1, %v1018_v3 }
 0x112   : > { %v733_v4 = vpop.f32.mrf.mxu0  ;;  %v829_v5 = vpop.f32.mrf.mxu1 }
 0x113   : > { %1085 = vst.msk [vmem:[%s1601_s26 + $0x80] sm:$0xff] %vm279_vm1, %v733_v4 }
 0x114   : > { %1117 = vst.msk [vmem:[%s1601_s26 + $0x180] sm:$0xff] %vm279_vm1, %v829_v5 }
 0x116   : > { %v925_v6 = vpop.f32.mrf.mxu2  ;;  %v1021_v7 = vpop.f32.mrf.mxu3 }
 0x117   : > { %1149 = vst.msk [vmem:[%s1601_s26 + $0x280] sm:$0xff] %vm279_vm1, %v925_v6 }
 0x118   : > { %1181 = vst.msk [vmem:[%s1601_s26 + $0x380] sm:$0xff] %vm279_vm1, %v1021_v7 }
 0x11a   : > { %v736_v8 = vpop.f32.mrf.mxu0  ;;  %v832_v9 = vpop.f32.mrf.mxu1 }
 0x11b   : > { %1086 = vst.msk [vmem:[%s1601_s26 + $0x88] sm:$0xff] %vm279_vm1, %v736_v8 }
 0x11c   : > { %1118 = vst.msk [vmem:[%s1601_s26 + $0x188] sm:$0xff] %vm279_vm1, %v832_v9 }
 0x11e   : > { %v928_v10 = vpop.f32.mrf.mxu2  ;;  %v1024_v11 = vpop.f32.mrf.mxu3 }
 0x11f   : > { %1150 = vst.msk [vmem:[%s1601_s26 + $0x288] sm:$0xff] %vm279_vm1, %v928_v10 }
 0x120   : > { %1182 = vst.msk [vmem:[%s1601_s26 + $0x388] sm:$0xff] %vm279_vm1, %v1024_v11 }
 0x122   : > { %v739_v12 = vpop.f32.mrf.mxu0  ;;  %v835_v13 = vpop.f32.mrf.mxu1 }
 0x123   : > { %1087 = vst.msk [vmem:[%s1601_s26 + $0x90] sm:$0xff] %vm279_vm1, %v739_v12 }
 0x124   : > { %1119 = vst.msk [vmem:[%s1601_s26 + $0x190] sm:$0xff] %vm279_vm1, %v835_v13 }
 0x126   : > { %v931_v14 = vpop.f32.mrf.mxu2  ;;  %v1027_v15 = vpop.f32.mrf.mxu3 }
 0x127   : > { %1151 = vst.msk [vmem:[%s1601_s26 + $0x290] sm:$0xff] %vm279_vm1, %v931_v14 }
 0x128   : > { %1183 = vst.msk [vmem:[%s1601_s26 + $0x390] sm:$0xff] %vm279_vm1, %v1027_v15 }
 0x12a   : > { %v742_v16 = vpop.f32.mrf.mxu0  ;;  %v838_v17 = vpop.f32.mrf.mxu1 }
 0x12b   : > { %1088 = vst.msk [vmem:[%s1601_s26 + $0x98] sm:$0xff] %vm279_vm1, %v742_v16 }
 0x12c   : > { %1120 = vst.msk [vmem:[%s1601_s26 + $0x198] sm:$0xff] %vm279_vm1, %v838_v17 }
 0x12e   : > { %v934_v18 = vpop.f32.mrf.mxu2  ;;  %v1030_v19 = vpop.f32.mrf.mxu3 }
 0x12f   : > { %1152 = vst.msk [vmem:[%s1601_s26 + $0x298] sm:$0xff] %vm279_vm1, %v934_v18 }
 0x130   : > { %1184 = vst.msk [vmem:[%s1601_s26 + $0x398] sm:$0xff] %vm279_vm1, %v1030_v19 }
 0x132   : > { %v745_v20 = vpop.f32.mrf.mxu0  ;;  %v841_v21 = vpop.f32.mrf.mxu1 }
 0x133   : > { %1089 = vst.msk [vmem:[%s1601_s26 + $0xa0] sm:$0xff] %vm279_vm1, %v745_v20 }
 0x134   : > { %1121 = vst.msk [vmem:[%s1601_s26 + $0x1a0] sm:$0xff] %vm279_vm1, %v841_v21 }
 0x136   : > { %v937_v22 = vpop.f32.mrf.mxu2  ;;  %v1033_v23 = vpop.f32.mrf.mxu3 }
 0x137   : > { %1153 = vst.msk [vmem:[%s1601_s26 + $0x2a0] sm:$0xff] %vm279_vm1, %v937_v22 }
 0x138   : > { %1185 = vst.msk [vmem:[%s1601_s26 + $0x3a0] sm:$0xff] %vm279_vm1, %v1033_v23 }
 0x13a   : > { %v748_v24 = vpop.f32.mrf.mxu0  ;;  %v844_v25 = vpop.f32.mrf.mxu1 }
 0x13b   : > { %1090 = vst.msk [vmem:[%s1601_s26 + $0xa8] sm:$0xff] %vm279_vm1, %v748_v24 }
 0x13c   : > { %1122 = vst.msk [vmem:[%s1601_s26 + $0x1a8] sm:$0xff] %vm279_vm1, %v844_v25 }
 0x13e   : > { %v940_v26 = vpop.f32.mrf.mxu2  ;;  %v1036_v27 = vpop.f32.mrf.mxu3 }
 0x13f   : > { %1154 = vst.msk [vmem:[%s1601_s26 + $0x2a8] sm:$0xff] %vm279_vm1, %v940_v26 }
 0x140   : > { %1186 = vst.msk [vmem:[%s1601_s26 + $0x3a8] sm:$0xff] %vm279_vm1, %v1036_v27 }
 0x142   : > { %v751_v28 = vpop.f32.mrf.mxu0  ;;  %v847_v29 = vpop.f32.mrf.mxu1 }
 0x143   : > { %1091 = vst.msk [vmem:[%s1601_s26 + $0xb0] sm:$0xff] %vm279_vm1, %v751_v28 }
 0x144   : > { %1123 = vst.msk [vmem:[%s1601_s26 + $0x1b0] sm:$0xff] %vm279_vm1, %v847_v29 }
 0x146   : > { %v943_v30 = vpop.f32.mrf.mxu2  ;;  %v1039_v31 = vpop.f32.mrf.mxu3 }
 0x147   : > { %1155 = vst.msk [vmem:[%s1601_s26 + $0x2b0] sm:$0xff] %vm279_vm1, %v943_v30 }
 0x148   : > { %1187 = vst.msk [vmem:[%s1601_s26 + $0x3b0] sm:$0xff] %vm279_vm1, %v1039_v31 }
 0x14a   : > { %v754_v32 = vpop.f32.mrf.mxu0  ;;  %v850_v33 = vpop.f32.mrf.mxu1 }
 0x14b   : > { %1092 = vst.msk [vmem:[%s1601_s26 + $0xb8] sm:$0xff] %vm279_vm1, %v754_v32 }
 0x14c   : > { %1124 = vst.msk [vmem:[%s1601_s26 + $0x1b8] sm:$0xff] %vm279_vm1, %v850_v33 }
 0x14e   : > { %v946_v34 = vpop.f32.mrf.mxu2  ;;  %v1042_v35 = vpop.f32.mrf.mxu3 }
 0x14f   : > { %1156 = vst.msk [vmem:[%s1601_s26 + $0x2b8] sm:$0xff] %vm279_vm1, %v946_v34 }
 0x150   : > { %1188 = vst.msk [vmem:[%s1601_s26 + $0x3b8] sm:$0xff] %vm279_vm1, %v1042_v35 }
 0x152   : > { %v757_v36 = vpop.f32.mrf.mxu0  ;;  %v853_v37 = vpop.f32.mrf.mxu1 }
 0x153   : > { %1093 = vst.msk [vmem:[%s1601_s26 + $0xc0] sm:$0xff] %vm279_vm1, %v757_v36 }
 0x154   : > { %1125 = vst.msk [vmem:[%s1601_s26 + $0x1c0] sm:$0xff] %vm279_vm1, %v853_v37 }
 0x156   : > { %v949_v38 = vpop.f32.mrf.mxu2  ;;  %v1045_v39 = vpop.f32.mrf.mxu3 }
 0x157   : > { %1157 = vst.msk [vmem:[%s1601_s26 + $0x2c0] sm:$0xff] %vm279_vm1, %v949_v38 }
 0x158   : > { %1189 = vst.msk [vmem:[%s1601_s26 + $0x3c0] sm:$0xff] %vm279_vm1, %v1045_v39 }
 0x15a   : > { %v760_v40 = vpop.f32.mrf.mxu0  ;;  %v856_v41 = vpop.f32.mrf.mxu1 }
 0x15b   : > { %1094 = vst.msk [vmem:[%s1601_s26 + $0xc8] sm:$0xff] %vm279_vm1, %v760_v40 }
 0x15c   : > { %1126 = vst.msk [vmem:[%s1601_s26 + $0x1c8] sm:$0xff] %vm279_vm1, %v856_v41 }
 0x15e   : > { %v952_v42 = vpop.f32.mrf.mxu2  ;;  %v1048_v43 = vpop.f32.mrf.mxu3 }
 0x15f   : > { %1158 = vst.msk [vmem:[%s1601_s26 + $0x2c8] sm:$0xff] %vm279_vm1, %v952_v42 }
 0x160   : > { %1190 = vst.msk [vmem:[%s1601_s26 + $0x3c8] sm:$0xff] %vm279_vm1, %v1048_v43 }
 0x162   : > { %v763_v44 = vpop.f32.mrf.mxu0  ;;  %v859_v45 = vpop.f32.mrf.mxu1 }
 0x163   : > { %1095 = vst.msk [vmem:[%s1601_s26 + $0xd0] sm:$0xff] %vm279_vm1, %v763_v44 }
 0x164   : > { %1127 = vst.msk [vmem:[%s1601_s26 + $0x1d0] sm:$0xff] %vm279_vm1, %v859_v45 }
 0x166   : > { %v955_v46 = vpop.f32.mrf.mxu2  ;;  %v1051_v47 = vpop.f32.mrf.mxu3 }
 0x167   : > { %1159 = vst.msk [vmem:[%s1601_s26 + $0x2d0] sm:$0xff] %vm279_vm1, %v955_v46 }
 0x168   : > { %1191 = vst.msk [vmem:[%s1601_s26 + $0x3d0] sm:$0xff] %vm279_vm1, %v1051_v47 }
 0x16a   : > { %v766_v48 = vpop.f32.mrf.mxu0  ;;  %v862_v49 = vpop.f32.mrf.mxu1 }
 0x16b   : > { %1096 = vst.msk [vmem:[%s1601_s26 + $0xd8] sm:$0xff] %vm279_vm1, %v766_v48 }
 0x16c   : > { %1128 = vst.msk [vmem:[%s1601_s26 + $0x1d8] sm:$0xff] %vm279_vm1, %v862_v49 }
 0x16e   : > { %v958_v50 = vpop.f32.mrf.mxu2  ;;  %v1054_v51 = vpop.f32.mrf.mxu3 }
 0x16f   : > { %1160 = vst.msk [vmem:[%s1601_s26 + $0x2d8] sm:$0xff] %vm279_vm1, %v958_v50 }
 0x170   : > { %1192 = vst.msk [vmem:[%s1601_s26 + $0x3d8] sm:$0xff] %vm279_vm1, %v1054_v51 }
 0x172   : > { %v769_v52 = vpop.f32.mrf.mxu0  ;;  %v865_v53 = vpop.f32.mrf.mxu1 }
 0x173   : > { %1097 = vst.msk [vmem:[%s1601_s26 + $0xe0] sm:$0xff] %vm279_vm1, %v769_v52 }
 0x174   : > { %1129 = vst.msk [vmem:[%s1601_s26 + $0x1e0] sm:$0xff] %vm279_vm1, %v865_v53 }
 0x176   : > { %v961_v54 = vpop.f32.mrf.mxu2  ;;  %v1057_v55 = vpop.f32.mrf.mxu3 }
 0x177   : > { %1161 = vst.msk [vmem:[%s1601_s26 + $0x2e0] sm:$0xff] %vm279_vm1, %v961_v54 }
 0x178   : > { %1193 = vst.msk [vmem:[%s1601_s26 + $0x3e0] sm:$0xff] %vm279_vm1, %v1057_v55 }
 0x17a   : > { %v772_v56 = vpop.f32.mrf.mxu0  ;;  %v868_v57 = vpop.f32.mrf.mxu1 }
 0x17b   : > { %1098 = vst.msk [vmem:[%s1601_s26 + $0xe8] sm:$0xff] %vm279_vm1, %v772_v56 }
 0x17c   : > { %1130 = vst.msk [vmem:[%s1601_s26 + $0x1e8] sm:$0xff] %vm279_vm1, %v868_v57 }
 0x17e   : > { %v964_v58 = vpop.f32.mrf.mxu2  ;;  %v1060_v59 = vpop.f32.mrf.mxu3 }
 0x17f   : > { %1162 = vst.msk [vmem:[%s1601_s26 + $0x2e8] sm:$0xff] %vm279_vm1, %v964_v58 }
 0x180   : > { %1194 = vst.msk [vmem:[%s1601_s26 + $0x3e8] sm:$0xff] %vm279_vm1, %v1060_v59 }
 0x182   : > { %v775_v60 = vpop.f32.mrf.mxu0  ;;  %v871_v61 = vpop.f32.mrf.mxu1 }
 0x183   : > { %1099 = vst.msk [vmem:[%s1601_s26 + $0xf0] sm:$0xff] %vm279_vm1, %v775_v60 }
 0x184   : > { %1131 = vst.msk [vmem:[%s1601_s26 + $0x1f0] sm:$0xff] %vm279_vm1, %v871_v61 }
 0x186   : > { %v967_v62 = vpop.f32.mrf.mxu2  ;;  %v1063_v63 = vpop.f32.mrf.mxu3 }
 0x187   : > { %1163 = vst.msk [vmem:[%s1601_s26 + $0x2f0] sm:$0xff] %vm279_vm1, %v967_v62 }
 0x188   : > { %1195 = vst.msk [vmem:[%s1601_s26 + $0x3f0] sm:$0xff] %vm279_vm1, %v1063_v63 }
 0x18a   : > { %v778_v0 = vpop.f32.mrf.mxu0  ;;  %v874_v1 = vpop.f32.mrf.mxu1 }
 0x18b   : > { %1100 = vst.msk [vmem:[%s1601_s26 + $0xf8] sm:$0xff] %vm279_vm1, %v778_v0 }
 0x18c   : > { %1132 = vst.msk [vmem:[%s1601_s26 + $0x1f8] sm:$0xff] %vm279_vm1, %v874_v1 }
 0x18e   : > { %v970_v2 = vpop.f32.mrf.mxu2  ;;  %v1066_v3 = vpop.f32.mrf.mxu3 }
 0x18f   : > { %1164 = vst.msk [vmem:[%s1601_s26 + $0x2f8] sm:$0xff] %vm279_vm1, %v970_v2 }
 0x190   : > { %1196 = vst.msk [vmem:[%s1601_s26 + $0x3f8] sm:$0xff] %vm279_vm1, %v1066_v3 }
 0x191 PF: > { %s12_s9 = sadd.s32 1, %s1419_s9  }
 0x192   : > { %p9_p4 = scmp.ge.s32.totalorder %s12_s9, 6  }
 0x194   :  { %11 = sbr.rel (!%p9_p4) target bundleno = 1 (0x1), region = 58 }

</bundles_post_ra>
